<compile_context>
chip_gen: v6e
topology: v6e:2x2x1
jax: 0.10.0
libtpu: 0.0.40
codegen_flags: <defaults>
</compile_context>

<pallas_src>
import functools

import jax
import jax.numpy as jnp
from jax.experimental import pallas as pl
from jax.experimental.pallas import tpu as pltpu


def _round_up(x, m):
    return ((x + m - 1) // m) * m


def _mlp_kernel(n_layers, activation, alpha, beta, *refs):
    """refs = (x_ref, W0, b0, W1, b1, ..., Wn-1, bn-1, out_ref)."""
    x_ref = refs[0]
    out_ref = refs[-1]
    wb = refs[1:-1]

    h = x_ref[...]                                   # bf16 (TILE_B, in)
    z = None
    for li in range(n_layers):
        w = wb[2 * li][...]                          # bf16 (in, out)
        b = wb[2 * li + 1][...]                      # f32  (1, out) -> broadcast
        z = jnp.dot(h, w, preferred_element_type=jnp.float32) + b
        if li < n_layers - 1:                        # hidden-layer activation (f32)
            if activation == 'relu':
                a = jnp.maximum(z, 0.0)
            elif activation == 'tanh':
                a = jnp.tanh(z)
            elif activation == 'sigmoid':
                a = jax.nn.sigmoid(z)
            else:
                raise ValueError(f"unsupported activation: {activation}")
            h = a.astype(jnp.bfloat16)               # next matmul in bf16 on MXU

    # torch.where(z < 0, tanh(z)*(1-2*alpha), tanh(z)*(1-2*beta)),
    # specialized at trace time (alpha/beta are Python floats).
    t = jnp.tanh(z)
    if alpha == beta:
        scale = 1.0 - 2.0 * alpha
        out = t if scale == 1.0 else t * scale
    else:
        out = t * jnp.where(z < 0.0, 1.0 - 2.0 * alpha, 1.0 - 2.0 * beta)
    out_ref[...] = out.astype(out_ref.dtype)


def mlp_forward(x, weights, biases, *, activation='relu', alpha=0.0, beta=0.0,
                tile_b=512):
    """Pallas-backed forward pass of MLPClassifierTorch.

    weights[i]: [in_dim, out_dim] (transpose of PyTorch layout), biases[i]: [out_dim].
    """
    assert len(weights) == len(biases)
    n_layers = len(weights)
    batch, in_dim = x.shape
    out_dim = weights[-1].shape[1]

    # --- lane-dense output: pad final layer to a multiple of 128 lanes -------
    out_pad = _round_up(out_dim, 128)
    w_last = jnp.pad(weights[-1], ((0, 0), (0, out_pad - out_dim)))
    b_last = jnp.pad(biases[-1], ((0, out_pad - out_dim),))
    weights = list(weights[:-1]) + [w_last]
    biases = list(biases[:-1]) + [b_last]

    # --- batch tiling: grid axis 0, "parallel" --------------------------------
    # 16-row granularity keeps bf16 sublane packing aligned; default tile cap
    # (512 rows) is sized for v7x's 64 MiB VMEM (can be raised on v5e/v6e).
    tb = min(_round_up(tile_b, 16), _round_up(batch, 16))
    padded_batch = _round_up(batch, tb)
    if padded_batch != batch:
        x = jnp.pad(x, ((0, padded_batch - batch), (0, 0)))

    args = [x.astype(jnp.bfloat16)]
    in_specs = [pl.BlockSpec((tb, in_dim), lambda i: (i, 0))]
    for w, b in zip(weights, biases):
        args.append(w.astype(jnp.bfloat16))
        in_specs.append(pl.BlockSpec(w.shape, lambda i: (0, 0)))      # resident
        b2 = b.reshape(1, -1).astype(jnp.float32)
        args.append(b2)
        in_specs.append(pl.BlockSpec(b2.shape, lambda i: (0, 0)))     # resident

    kernel = functools.partial(_mlp_kernel, n_layers, activation, alpha, beta)

    out = pl.pallas_call(
        kernel,
        out_shape=jax.ShapeDtypeStruct((padded_batch, out_pad), jnp.float32),
        grid=(padded_batch // tb,),
        in_specs=in_specs,
        out_specs=pl.BlockSpec((tb, out_pad), lambda i: (i, 0)),
        compiler_params=pltpu.CompilerParams(
            dimension_semantics=("parallel",)),
    )(*args)

    # slice off batch padding and the lane padding of the final layer
    return out[:batch, :out_dim]


def init_params(key, input_dim, hidden_layer_sizes):
    """Xavier-uniform weights (stored [in, out]) + zero biases, matching __init__."""
    layer_sizes = [input_dim] + list(hidden_layer_sizes) + [1]
    weights, biases = [], []
    for i in range(len(layer_sizes) - 1):
        fan_in, fan_out = layer_sizes[i], layer_sizes[i + 1]
        key, sub = jax.random.split(key)
        limit = (6.0 / (fan_in + fan_out)) ** 0.5
        w = jax.random.uniform(sub, (fan_in, fan_out), jnp.float32,
                               minval=-limit, maxval=limit)
        b = jnp.zeros((fan_out,), jnp.float32)
        weights.append(w)
        biases.append(b)
    return weights, biases


def _reference_forward(x, weights, biases, activation='relu', alpha=0.0, beta=0.0):
    """Pure-JAX f32 reference for validation."""
    h = x
    for li, (w, b) in enumerate(zip(weights, biases)):
        h = h @ w + b
        if li < len(weights) - 1:
            if activation == 'relu':
                h = jnp.maximum(h, 0.0)
            elif activation == 'tanh':
                h = jnp.tanh(h)
            elif activation == 'sigmoid':
                h = jax.nn.sigmoid(h)
    t = jnp.tanh(h)
    return jnp.where(h < 0.0, t * (1.0 - 2.0 * alpha), t * (1.0 - 2.0 * beta))


if __name__ == "__main__":
    # Small shapes consistent with the module: x is [batch, input_dim].
    batch = 8
    input_dim = 16
    hidden_layer_sizes = (32,)
    activation = 'relu'

    key = jax.random.PRNGKey(0)
    key, xkey = jax.random.split(key)
    x = jax.random.normal(xkey, (batch, input_dim), jnp.float32)

    weights, biases = init_params(key, input_dim, hidden_layer_sizes)

    # Exercise both epilogue specializations (alpha==beta and alpha!=beta).
    for alpha, beta in [(0.0, 0.0), (0.1, 0.25)]:
        out = mlp_forward(x, weights, biases,
                          activation=activation, alpha=alpha, beta=beta)
        out = jax.block_until_ready(out)

        ref = _reference_forward(x, weights, biases,
                                 activation=activation, alpha=alpha, beta=beta)
        assert out.shape == (batch, 1)
        # bf16 matmul operands (f32 accumulation) -> loosened tolerance vs f32 ref.
        assert jnp.allclose(out, ref, atol=5e-2, rtol=5e-2), \
            f"mismatch vs reference (alpha={alpha}, beta={beta})"

    # TODO(synk): fit/predict/predict_proba (Adam/LBFGS training loop) are host-side
    # training utilities, not part of the forward kernel.
    print("KERNEL_OK")
</pallas_src>

<mosaic_0001>
module attributes {stable_mosaic.version = 11 : i64} {
  func.func @_mlp_kernel(%arg0: i32, %arg1: memref<16x16xbf16, #tpu.memory_space<vmem>>, %arg2: memref<16x32xbf16, #tpu.memory_space<vmem>>, %arg3: memref<1x32xf32, #tpu.memory_space<vmem>>, %arg4: memref<32x128xbf16, #tpu.memory_space<vmem>>, %arg5: memref<1x128xf32, #tpu.memory_space<vmem>>, %arg6: memref<16x128xf32, #tpu.memory_space<vmem>>) attributes {dimension_semantics = [#tpu.dimension_semantics<parallel>], iteration_bounds = array<i64: 1>, scalar_prefetch = 0 : i64, scratch_operands = 0 : i64, tpu.core_type = #tpu.core_type<tc>, window_params = [{transform_indices = @transform_0, window_bounds = array<i64: 16, 16>}, {pipeline_mode = #tpu.pipeline_mode<synchronous>, transform_indices = @transform_1, window_bounds = array<i64: 16, 32>}, {pipeline_mode = #tpu.pipeline_mode<synchronous>, transform_indices = @transform_2, window_bounds = array<i64: 1, 32>}, {pipeline_mode = #tpu.pipeline_mode<synchronous>, transform_indices = @transform_3, window_bounds = array<i64: 32, 128>}, {pipeline_mode = #tpu.pipeline_mode<synchronous>, transform_indices = @transform_4, window_bounds = array<i64: 1, 128>}, {transform_indices = @transform_5, window_bounds = array<i64: 16, 128>}]} {
    %c0 = arith.constant 0 : index
    %c0_0 = arith.constant 0 : index
    %0 = vector.load %arg1[%c0, %c0_0] : memref<16x16xbf16, #tpu.memory_space<vmem>>, vector<16x16xbf16>
    %c0_1 = arith.constant 0 : index
    %c0_2 = arith.constant 0 : index
    %1 = vector.load %arg2[%c0_1, %c0_2] : memref<16x32xbf16, #tpu.memory_space<vmem>>, vector<16x32xbf16>
    %c0_3 = arith.constant 0 : index
    %c0_4 = arith.constant 0 : index
    %2 = vector.load %arg3[%c0_3, %c0_4] : memref<1x32xf32, #tpu.memory_space<vmem>>, vector<1x32xf32>
    %cst = arith.constant dense<0.000000e+00> : vector<16x32xf32>
    %3 = tpu.matmul %0, %1, %cst {dimension_numbers = #tpu.dot_dimension_numbers<[1], [0], [0], [1], [0, 0, 1, 1], [], []>} : vector<16x16xbf16>, vector<16x32xbf16>, vector<16x32xf32> -> vector<16x32xf32>
    %4 = vector.broadcast %2 : vector<1x32xf32> to vector<16x32xf32>
    %5 = arith.addf %3, %4 : vector<16x32xf32>
    %cst_5 = arith.constant 0.000000e+00 : f32
    %6 = vector.broadcast %cst_5 : f32 to vector<16x32xf32>
    %7 = arith.maximumf %5, %6 : vector<16x32xf32>
    %8 = arith.truncf %7 : vector<16x32xf32> to vector<16x32xbf16>
    %c0_6 = arith.constant 0 : index
    %c0_7 = arith.constant 0 : index
    %9 = vector.load %arg4[%c0_6, %c0_7] : memref<32x128xbf16, #tpu.memory_space<vmem>>, vector<32x128xbf16>
    %c0_8 = arith.constant 0 : index
    %c0_9 = arith.constant 0 : index
    %10 = vector.load %arg5[%c0_8, %c0_9] : memref<1x128xf32, #tpu.memory_space<vmem>>, vector<1x128xf32>
    %cst_10 = arith.constant dense<0.000000e+00> : vector<16x128xf32>
    %11 = tpu.matmul %8, %9, %cst_10 {dimension_numbers = #tpu.dot_dimension_numbers<[1], [0], [0], [1], [0, 0, 1, 1], [], []>} : vector<16x32xbf16>, vector<32x128xbf16>, vector<16x128xf32> -> vector<16x128xf32>
    %12 = vector.broadcast %10 : vector<1x128xf32> to vector<16x128xf32>
    %13 = arith.addf %11, %12 : vector<16x128xf32>
    %14 = math.tanh %13 : vector<16x128xf32>
    %c0_11 = arith.constant 0 : index
    %c0_12 = arith.constant 0 : index
    %15 = vector.load %arg6[%c0_11, %c0_12] : memref<16x128xf32, #tpu.memory_space<vmem>>, vector<16x128xf32>
    tpu.vector_store %arg6[%c0_11, %c0_12], %14 {strides = array<i32>} : memref<16x128xf32, #tpu.memory_space<vmem>>, vector<16x128xf32>,
    return
  }
  func.func @transform_0(%arg0: i32) -> (i32, i32) {
    %c0_i32 = arith.constant 0 : i32
    %c0_i32_0 = arith.constant 0 : i32
    return %arg0, %c0_i32 : i32, i32
  }
  func.func @transform_1(%arg0: i32) -> (i32, i32) {
    %c0_i32 = arith.constant 0 : i32
    %c0_i32_0 = arith.constant 0 : i32
    %c0_i32_1 = arith.constant 0 : i32
    return %c0_i32, %c0_i32_0 : i32, i32
  }
  func.func @transform_2(%arg0: i32) -> (i32, i32) {
    %c0_i32 = arith.constant 0 : i32
    %c0_i32_0 = arith.constant 0 : i32
    %c0_i32_1 = arith.constant 0 : i32
    return %c0_i32, %c0_i32_0 : i32, i32
  }
  func.func @transform_3(%arg0: i32) -> (i32, i32) {
    %c0_i32 = arith.constant 0 : i32
    %c0_i32_0 = arith.constant 0 : i32
    %c0_i32_1 = arith.constant 0 : i32
    return %c0_i32, %c0_i32_0 : i32, i32
  }
  func.func @transform_4(%arg0: i32) -> (i32, i32) {
    %c0_i32 = arith.constant 0 : i32
    %c0_i32_0 = arith.constant 0 : i32
    %c0_i32_1 = arith.constant 0 : i32
    return %c0_i32, %c0_i32_0 : i32, i32
  }
  func.func @transform_5(%arg0: i32) -> (i32, i32) {
    %c0_i32 = arith.constant 0 : i32
    %c0_i32_0 = arith.constant 0 : i32
    return %arg0, %c0_i32 : i32, i32
  }
}

</mosaic_0001>

<bundles_post_ra>
// kernel: tpu_custom_call.1
= control target key start
LH: loop header
LB: loop body
LE: loop exit
PB: predicated region body
PF: predicated region fallthrough
CT: control target
= control target key end

     0   :  { %10 = vsyncpa [#allocation3], 0  ;;  %s412_s0 = inlined_call_operand.hbm [shape: bf16[16,16], index: 0, kind: input, shape index: {}]   ;;  %s413_s1 = inlined_call_operand.hbm [shape: bf16[16,32], index: 1, kind: input, shape index: {}]   ;;  %s414_s2 = inlined_call_operand.vmem [shape: f32[1,32], index: 2, kind: input, shape index: {}]   ;;  %s415_s3 = inlined_call_operand.hbm [shape: bf16[32,128], index: 3, kind: input, shape index: {}]   ;;  %s416_s4 = inlined_call_operand.vmem [shape: f32[1,128], index: 4, kind: input, shape index: {}]   ;;  %s417_s5 = inlined_call_operand.hbm [shape: f32[16,128], index: 5, kind: output, shape index: {}]  }
   0x1   :  { %11 = vsyncpa [#allocation6], 0 }
   0x2   :  { %12 = vsyncpa [#allocation4], 0  ;;  %s354_s18 = smov [#allocation5]   ;;  %s355_s20 = smov [#allocation2]  }
   0x3   :  { %s30_s19 = sshll.u32 %s354_s18, 4  ;;  %s18_s21 = sshll.u32 %s355_s20, 4  ;;  %s31_s19 = int_to_ptr.vmem [resolvable:$true] %s30_s19  ;;  %s19_s21 = int_to_ptr.vmem [resolvable:$true] %s18_s21 }
   0x4   :  { %s276_s22 = scalar_lea.vmem %s31_s19, 128  ;;  %p281_p1 = scmp.lt.s32.totalorder %s31_s19, %s31_s19 }
   0x5   :  { %p277_p0 = scmp.ne.s32.totalorder %s31_s19, %s276_s22  ;;  %p282_p2 = scmp.lt.s32.totalorder %s276_s22, %s276_s22 }
   0x7   :  { %p283_p3 = por %p282_p2, %p281_p1 }
   0x9   :  { %p284_p4 = pnand %p283_p3, %p277_p0 }
   0xb   :  { %287 = shalt.err (!%p284_p4)
}
   0xc   :  { %s356_s23 = smov 64   ;;  %s357_s24 = smov 4  }
   0xd   :  { %36 = dma.hbm_to_vmem [thread:$0]  %s413_s1, 128, %s31_s19, [#allocation6], %s356_s23, %s356_s23, %s357_s24  }
   0xe   :  { %s296_s27 = scalar_lea.vmem %s19_s21, 128  ;;  %p301_p6 = scmp.lt.s32.totalorder %s19_s21, %s19_s21 }
   0xf   :  { %p297_p5 = scmp.ne.s32.totalorder %s19_s21, %s296_s27  ;;  %p302_p7 = scmp.lt.s32.totalorder %s296_s27, %s296_s27 }
  0x11   :  { %p303_p8 = por %p302_p7, %p301_p6 }
  0x13   :  { %p304_p9 = pnand %p303_p8, %p297_p5 }
  0x15   :  { %307 = shalt.err (!%p304_p9)
}
  0x16   :  { %24 = dma.hbm_to_vmem [thread:$0]  %s412_s0, 128, %s19_s21, [#allocation3], %s356_s23, %s356_s23, %s357_s24  }
  0x17   :  { %s358_s30 = smov [#allocation7]  }
  0x18   :  { %s44_s6 = sshll.u32 %s358_s30, 4  ;;  %s45_s6 = int_to_ptr.vmem [resolvable:$true] %s44_s6 }
  0x19   :  { %s316_s7 = scalar_lea.vmem %s45_s6, 256  ;;  %p321_p11 = scmp.lt.s32.totalorder %s45_s6, %s45_s6 }
  0x1a   :  { %p317_p10 = scmp.ne.s32.totalorder %s45_s6, %s316_s7  ;;  %p322_p12 = scmp.lt.s32.totalorder %s316_s7, %s316_s7 }
  0x1c   :  { %p323_p13 = por %p322_p12, %p321_p11 }
  0x1e   :  { %p324_p0 = pnand %p323_p13, %p317_p10 }
  0x20   :  { %327 = shalt.err (!%p324_p0)
}
  0x21   :  { %50 = dma.hbm_to_vmem [thread:$0]  %s415_s3, 256, %s45_s6, [#allocation6], %s356_s23, %s356_s23, %s357_s24  }
  0x22   :  { %348 = dma.done.wait [#allocation3], 128  }
  0x23   :  { %349 = vsyncadd [#allocation3], 4294967168 }
  0x24   :  { %350 = dma.done.wait [#allocation6], 384  }
  0x25   :  { %351 = vsyncadd [#allocation6], 4294966912  ;;  %v359_v0 = vmov 0.0   ;;  %vm360_vm0 = vmmov 0   ;;  %v260_v1 = vld [vmem:[#allocation5] sm:$0xff]   ;;  %v261_v2 = vld [vmem:[#allocation2] sm:$0xff]  }
  0x26   :  { %236 = vmatprep.subr.bf16.mxu0 %v359_v0  ;;  %238 = vmatprep.mubr.msk.bf16.mxu0 %vm360_vm0, %v359_v0  ;;  %vm85_vm1 = vcmask 130048   ;;  %v262_v3 = vld [vmem:[#allocation7 + $0x8] sm:$0xff]   ;;  %v263_v4 = vld [vmem:[#allocation7] sm:$0xff]   ;;  %v223_v5 = vld [vmem:[%s414_s2] ss:$0 sm:$0xff]  ;;  %vm156_vm2 = vcmask 261120  }
  0x27   :  { %242 = vmatprep.subr.bf16.mxu1 %v359_v0  ;;  %246 = vmatprep.mubr.msk.bf16.mxu1 %vm360_vm0, %v359_v0  ;;  %v227_v15 = vld [vmem:[%s416_s4] ss:$0 sm:$0xff]  ;;  %s361_s2 = smov [#allocation8]  }
  0x28   :  { %237 = vmatpush3.bf16.msra.mxu0 %v260_v1  ;;  %243 = vmatpush3.bf16.msra.mxu1 %v262_v3  ;;  %s210_s11 = sshll.u32 %s361_s2, 4  ;;  %s211_s11 = int_to_ptr.vmem [resolvable:$true] %s210_s11 }
  0x29   :  { %244 = vmatprep.subr.bf16.mxu1 %v359_v0  ;;  %s328_s12 = scalar_lea.vmem %s211_s11, 256  ;;  %p333_p2 = scmp.lt.s32.totalorder %s211_s11, %s211_s11 }
  0x2a   :  { %p329_p1 = scmp.ne.s32.totalorder %s211_s11, %s328_s12  ;;  %p334_p3 = scmp.lt.s32.totalorder %s328_s12, %s328_s12 }
  0x2b   :  { %239 = vmatmul.mubr.msk.bf16.vlgmr.msra.gmra.mxu0 %vm85_vm1, %v261_v2 }
  0x2c   :  { %245 = vmatpush3.bf16.msra.mxu1 %v263_v4  ;;  %p335_p4 = por %p334_p3, %p333_p2 }
  0x2e   :  { %p336_p5 = pnand %p335_p4, %p329_p1 }
  0xeb   :  { %v123_v6 = vpop.f32.mrf.mxu0 }
  0xec   :  { %v124_v8 = vadd.f32 %v223_v5, %v123_v6 }
  0xed   :  { %v240_v7 = vpop.f32.mrf.mxu0 }
  0xee   :  { %v130_v12 = vmax.f32 %v124_v8, 0.0 }
  0xef   :  { %v126_v9 = vpop.f32.mrf.mxu0 }
  0xf0   :  { %v127_v10 = vadd.f32 %v223_v5, %v126_v9 }
  0xf1   :  { %v241_v11 = vpop.f32.mrf.mxu0 }
  0xf2   :  { %v131_v13 = vmax.f32 %v127_v10, 0.0 }
  0xf4   :  { %v132_v14 = vpack.c.bf16 %v131_v13, %v130_v12 }
  0xf6   :  { %247 = vmatmul.mubr.msk.bf16.vlgmr.msra.gmra.mxu1 %vm156_vm2, %v132_v14 }
 0x1b6   :  { %v194_v16 = vpop.f32.mrf.mxu1 }
 0x1b7   :  { %v195_v17 = vadd.f32 %v227_v15, %v194_v16 }
 0x1b8   :  { %v248_v18 = vpop.f32.mrf.mxu1 }
 0x1b9   :  { %264 = vtanh.f32 %v195_v17 }
 0x1ba   :  { %v197_v19 = vpop.f32.mrf.mxu1 }
 0x1bb   :  { %v198_v20 = vadd.f32 %v227_v15, %v197_v19 }
 0x1bc   :  { %v249_v21 = vpop.f32.mrf.mxu1 }
 0x1bd   :  { %266 = vtanh.f32 %v198_v20 }
 0x1c6   :  { %v265_v22 = vpop.eup %264 }
 0x1c7   :  { %203 = vst [vmem:[#allocation8] sm:$0xff] %v265_v22 }
 0x1ca   :  { %v267_v23 = vpop.eup %266 }
 0x1cb   :  { %204 = vst [vmem:[#allocation8 + $0x8] sm:$0xff] %v267_v23 }
 0x1cc   :  { %339 = shalt.err (!%p336_p5)
}
 0x1cd   :  { %s362_s4 = smov 128   ;;  %s363_s13 = smov 8  }
 0x1ce   :  { %216 = dma.vmem_to_hbm [thread:$0]  %s211_s11, 256, %s417_s5, [#allocation4], %s362_s4, %s362_s4, %s363_s13  }
 0x1cf   :  { %352 = dma.done.wait [#allocation4], 256  }
 0x1d0   :  { %353 = vsyncadd [#allocation4], 4294967040 }
 0x1d1   :  { %220 = vsyncpa [#allocation3], 1 }
 0x1d2   :  { %221 = vsyncpa [#allocation6], 1 }
 0x1d3   :  { %222 = vsyncpa [#allocation4], 1 }

</bundles_post_ra>
